<compile_context>
chip_gen: v7x
topology: tpu7x:2x2x1
jax: 0.10.0
libtpu: 0.0.40
codegen_flags: <defaults>
</compile_context>

<pallas_src>
import functools
import math

import jax
import jax.numpy as jnp
from jax.experimental import pallas as pl
from jax.experimental.pallas import tpu as pltpu


def _rms_norm_kernel(x_ref, w_ref, o_ref, *, eps):
    """Plain per-row RMSNorm.  x_ref: (tile_rows, hidden); w_ref: (1, hidden)."""
    x = x_ref[...].astype(jnp.float32)
    var = jnp.mean(x * x, axis=-1, keepdims=True)            # (tile_rows, 1)
    inv = jax.lax.rsqrt(var + eps)
    # TODO(synk): on v6e/v7x with bf16 output the final multiply could run in
    # bf16 (native VPU) to trim VALU width; kept in f32 for v5e safety.
    o_ref[...] = (x * inv * w_ref[...].astype(jnp.float32)).astype(o_ref.dtype)


def _rms_norm_folded_kernel(x_ref, w_ref, s_ref, o_ref, *, eps):
    """Lane-folded RMSNorm: `group` logical rows of width `hidden` are packed
    side-by-side into one lane-dense physical row (lane_w = lcm(hidden, 128)).
    The per-segment mean of squares is a single MXU matmul against a static
    block-diagonal matrix s_ref (entries 1/hidden inside each segment), which
    also yields the per-lane broadcast for free and keeps VPU/XLU slots clear
    for this memory-bound kernel."""
    x = x_ref[...].astype(jnp.float32)
    msq = jnp.dot(x * x, s_ref[...],
                  preferred_element_type=jnp.float32,
                  precision=jax.lax.Precision.HIGHEST)       # ~f32-exact segment sum
    inv = jax.lax.rsqrt(msq + eps)
    o_ref[...] = (x * inv * w_ref[...].astype(jnp.float32)).astype(o_ref.dtype)


def _round_up(x, m):
    return ((x + m - 1) // m) * m


def npu_rms_norm(hidden_states, weight, eps=1e-6, *, out_dtype=None,
                 max_tile_rows=8192):
    """Pallas implementation of torch_npu.npu_rms_norm(x.to(weight), weight, eps)[0].

    out_dtype: None -> weight.dtype (module semantics).  Pass the activation
    dtype (e.g. jnp.bfloat16) to halve output HBM traffic when acceptable.
    """
    orig_shape = hidden_states.shape
    hidden = int(orig_shape[-1])
    if out_dtype is None:
        out_dtype = weight.dtype
    out_dtype = jnp.dtype(out_dtype)

    rows = 1
    for d in orig_shape[:-1]:
        rows *= int(d)
    if rows == 0:
        return jnp.zeros(orig_shape, out_dtype)

    # Keep the ORIGINAL input dtype in HBM; cast to f32 inside the kernel.
    x2 = hidden_states.reshape(rows, hidden)

    # ---- lane-folding decision (lane-dense loads/stores for small hidden) ----
    fold = False
    group = 1
    lane_w = hidden
    if hidden % 128 != 0:
        cand = math.lcm(hidden, 128)
        if cand <= 1024:                      # bounds S-matrix & unroll cost
            fold = True
            lane_w = cand
            group = cand // hidden

    pad = 0
    if fold:
        pad = (-rows) % group
        if pad:
            # TODO(synk): a peeled second call would avoid this HBM round-trip;
            # the padded copy is still far cheaper than lane-sparse masked stores.
            x2 = jnp.pad(x2, ((0, pad), (0, 0)))
        n_rows = (rows + pad) // group
        x_in = x2.reshape(n_rows, lane_w)            # row-major: free reshape
        w_in = jnp.tile(weight, group).reshape(1, lane_w)
        seg = jnp.arange(lane_w) // hidden
        s_mat = ((seg[:, None] == seg[None, :]).astype(jnp.float32)
                 * (1.0 / float(hidden)))            # block-diagonal mean matrix
        kernel = functools.partial(_rms_norm_folded_kernel, eps=eps)
    else:
        n_rows = rows
        x_in = x2
        w_in = weight.reshape(1, hidden)
        s_mat = None
        kernel = functools.partial(_rms_norm_kernel, eps=eps)

    in_bytes = x_in.dtype.itemsize
    out_bytes = out_dtype.itemsize

    # ---- VMEM budget: derive from the actual chip (v7x has 64 MiB physical) ----
    try:
        vmem_cap = int(pltpu.get_tpu_info().vmem_capacity_bytes)
    except Exception:
        vmem_cap = 64 << 20                           # conservative fallback
    vmem_limit = int(min(vmem_cap * 3 // 4, 96 << 20))

    # Per-row footprint: double-buffered input + output tiles plus ~2 f32
    # temporaries per element (x_f32 / y) that the kernel materializes.
    per_row = lane_w * (2 * in_bytes + 2 * out_bytes + 2 * 4)
    fixed = (2 * lane_w * lane_w * 4) if fold else 0  # resident S matrix
    tile_budget = max((vmem_limit // 2) - fixed, 1 << 20)

    align = 16 if in_bytes < 4 else 8                 # bf16 packs (16,128)/vreg
    needed = _round_up(n_rows, align)

    tile_rows = tile_budget // max(per_row, 1)
    tile_rows = (tile_rows // align) * align
    tile_rows = max(align, min(tile_rows, max_tile_rows))

    # Guarantee several grid steps when the problem is big enough (pipelining
    # and megacore sharding on v7x's 2 TensorCores); tiny problems keep (1,).
    max_steps = max(1, needed // align)
    target_steps = min(8, max_steps)
    step_cap = _round_up(-(-n_rows // target_steps), align)
    tile_rows = max(align, min(tile_rows, needed, step_cap))

    grid = (pl.cdiv(n_rows, tile_rows),)

    if fold:
        in_specs = [
            pl.BlockSpec((tile_rows, lane_w), lambda i: (i, 0)),
            pl.BlockSpec((1, lane_w), lambda i: (0, 0)),
            pl.BlockSpec((lane_w, lane_w), lambda i: (0, 0)),
        ]
        args = (x_in, w_in, s_mat)
    else:
        in_specs = [
            pl.BlockSpec((tile_rows, lane_w), lambda i: (i, 0)),
            pl.BlockSpec((1, lane_w), lambda i: (0, 0)),
        ]
        args = (x_in, w_in)

    out = pl.pallas_call(
        kernel,
        out_shape=jax.ShapeDtypeStruct((n_rows, lane_w), out_dtype),
        grid_spec=pltpu.PrefetchScalarGridSpec(
            num_scalar_prefetch=0,
            grid=grid,
            in_specs=in_specs,
            out_specs=pl.BlockSpec((tile_rows, lane_w), lambda i: (i, 0)),
        ),
        compiler_params=pltpu.CompilerParams(
            dimension_semantics=("parallel",),
            vmem_limit_bytes=vmem_limit,
        ),
    )(*args)

    if fold:
        out = out.reshape(rows + pad, hidden)
        if pad:
            out = out[:rows]
    return out.reshape(orig_shape)


def rms_norm_reference(hidden_states, weight, eps=1e-6):
    x = hidden_states.astype(weight.dtype)
    var = jnp.mean(x * x, axis=-1, keepdims=True)
    return x * jax.lax.rsqrt(var + eps) * weight


if __name__ == "__main__":
    key = jax.random.PRNGKey(0)
    eps = 1e-6

    # 1) hidden=32 (lane-folded: lane_w=128, group=4), bf16 activations.
    hidden = 32
    weight = jnp.ones((hidden,), dtype=jnp.float32)
    x = jax.random.normal(key, (2, 8, hidden), dtype=jnp.bfloat16)

    out = jax.block_until_ready(npu_rms_norm(x, weight, eps))
    ref = rms_norm_reference(x, weight, eps)
    assert out.shape == x.shape and out.dtype == jnp.float32
    assert jnp.allclose(out, ref, atol=1e-4, rtol=1e-4), "mismatch (folded, f32 out)"

    # 1b) bf16 output mode (the bandwidth-saving option from the perf review).
    out_bf16 = jax.block_until_ready(
        npu_rms_norm(x, weight, eps, out_dtype=jnp.bfloat16))
    assert out_bf16.dtype == jnp.bfloat16
    assert jnp.allclose(out_bf16.astype(jnp.float32), ref, atol=5e-2, rtol=5e-2), \
        "mismatch (folded, bf16 out)"

    # 2) hidden=256 (plain lane-dense path) with a ragged row count (15 rows).
    hidden2 = 256
    weight2 = jnp.ones((hidden2,), dtype=jnp.float32)
    x2 = jax.random.normal(jax.random.PRNGKey(1), (3, 5, hidden2), dtype=jnp.bfloat16)
    out2 = jax.block_until_ready(npu_rms_norm(x2, weight2, eps))
    ref2 = rms_norm_reference(x2, weight2, eps)
    assert out2.shape == x2.shape and out2.dtype == jnp.float32
    assert jnp.allclose(out2, ref2, atol=1e-4, rtol=1e-4), "mismatch (plain path)"

    # 3) hidden=48 (lcm-folded: lane_w=384, group=8) with rows=10 (row padding).
    hidden3 = 48
    weight3 = jnp.ones((hidden3,), dtype=jnp.float32)
    x3 = jax.random.normal(jax.random.PRNGKey(2), (2, 5, hidden3), dtype=jnp.bfloat16)
    out3 = jax.block_until_ready(npu_rms_norm(x3, weight3, eps))
    ref3 = rms_norm_reference(x3, weight3, eps)
    assert out3.shape == x3.shape and out3.dtype == jnp.float32
    assert jnp.allclose(out3, ref3, atol=1e-4, rtol=1e-4), "mismatch (lcm-folded + pad)"

    print("KERNEL_OK")
</pallas_src>

<mosaic_0001>
module attributes {stable_mosaic.version = 11 : i64} {
  func.func @_rms_norm_folded_kernel(%arg0: i32, %arg1: memref<16x128xbf16, #tpu.memory_space<vmem>>, %arg2: memref<1x128xf32, #tpu.memory_space<vmem>>, %arg3: memref<128x128xf32, #tpu.memory_space<vmem>>, %arg4: memref<16x128xf32, #tpu.memory_space<vmem>>) attributes {dimension_semantics = [#tpu.dimension_semantics<parallel>], iteration_bounds = array<i64: 1>, scalar_prefetch = 0 : i64, scratch_operands = 0 : i64, tpu.core_type = #tpu.core_type<tc>, window_params = [{transform_indices = @transform_0, window_bounds = array<i64: 16, 128>}, {pipeline_mode = #tpu.pipeline_mode<synchronous>, transform_indices = @transform_1, window_bounds = array<i64: 1, 128>}, {pipeline_mode = #tpu.pipeline_mode<synchronous>, transform_indices = @transform_2, window_bounds = array<i64: 128, 128>}, {transform_indices = @transform_3, window_bounds = array<i64: 16, 128>}]} {
    %c0 = arith.constant 0 : index
    %c0_0 = arith.constant 0 : index
    %0 = vector.load %arg1[%c0, %c0_0] : memref<16x128xbf16, #tpu.memory_space<vmem>>, vector<16x128xbf16>
    %1 = arith.extf %0 : vector<16x128xbf16> to vector<16x128xf32>
    %2 = arith.mulf %1, %1 : vector<16x128xf32>
    %c0_1 = arith.constant 0 : index
    %c0_2 = arith.constant 0 : index
    %3 = vector.load %arg3[%c0_1, %c0_2] : memref<128x128xf32, #tpu.memory_space<vmem>>, vector<128x128xf32>
    %cst = arith.constant dense<0.000000e+00> : vector<16x128xf32>
    %4 = tpu.matmul %2, %3, %cst {dimension_numbers = #tpu.dot_dimension_numbers<[1], [0], [0], [1], [0, 0, 1, 1], [], []>, precision = #tpu.contract_precision<fp32>} : vector<16x128xf32>, vector<128x128xf32>, vector<16x128xf32> -> vector<16x128xf32>
    %cst_3 = arith.constant 9.99999997E-7 : f32
    %5 = vector.broadcast %cst_3 : f32 to vector<16x128xf32>
    %6 = arith.addf %4, %5 : vector<16x128xf32>
    %7 = math.rsqrt %6 : vector<16x128xf32>
    %8 = arith.mulf %1, %7 : vector<16x128xf32>
    %c0_4 = arith.constant 0 : index
    %c0_5 = arith.constant 0 : index
    %9 = vector.load %arg2[%c0_4, %c0_5] : memref<1x128xf32, #tpu.memory_space<vmem>>, vector<1x128xf32>
    %10 = vector.broadcast %9 : vector<1x128xf32> to vector<16x128xf32>
    %11 = arith.mulf %8, %10 : vector<16x128xf32>
    %c0_6 = arith.constant 0 : index
    %c0_7 = arith.constant 0 : index
    %12 = vector.load %arg4[%c0_6, %c0_7] : memref<16x128xf32, #tpu.memory_space<vmem>>, vector<16x128xf32>
    tpu.vector_store %arg4[%c0_6, %c0_7], %11 {strides = array<i32>} : memref<16x128xf32, #tpu.memory_space<vmem>>, vector<16x128xf32>,
    return
  }
  func.func @transform_0(%arg0: i32) -> (i32, i32) {
    %c0_i32 = arith.constant 0 : i32
    %c0_i32_0 = arith.constant 0 : i32
    return %arg0, %c0_i32 : i32, i32
  }
  func.func @transform_1(%arg0: i32) -> (i32, i32) {
    %c0_i32 = arith.constant 0 : i32
    %c0_i32_0 = arith.constant 0 : i32
    %c0_i32_1 = arith.constant 0 : i32
    return %c0_i32, %c0_i32_0 : i32, i32
  }
  func.func @transform_2(%arg0: i32) -> (i32, i32) {
    %c0_i32 = arith.constant 0 : i32
    %c0_i32_0 = arith.constant 0 : i32
    %c0_i32_1 = arith.constant 0 : i32
    return %c0_i32, %c0_i32_0 : i32, i32
  }
  func.func @transform_3(%arg0: i32) -> (i32, i32) {
    %c0_i32 = arith.constant 0 : i32
    %c0_i32_0 = arith.constant 0 : i32
    return %arg0, %c0_i32 : i32, i32
  }
}

</mosaic_0001>

<bundles_post_ra>
// kernel: tpu_custom_call.1
= control target key start
LH: loop header
LB: loop body
LE: loop exit
PB: predicated region body
PF: predicated region fallthrough
CT: control target
= control target key end

     0   :  { %8 = vsyncpa [#allocation3], 0  ;;  %s1790_s0 = inlined_call_operand.hbm [shape: bf16[4,128], index: 0, kind: input, shape index: {}]   ;;  %s1791_s1 = inlined_call_operand.vmem [shape: f32[1,128], index: 1, kind: input, shape index: {}]   ;;  %s1792_s2 = inlined_call_operand.hbm [shape: f32[128,128], index: 2, kind: input, shape index: {}]   ;;  %s1793_s3 = inlined_call_operand.hbm [shape: f32[4,128], index: 3, kind: output, shape index: {}]  }
   0x1   :  { %9 = vsyncpa [#allocation6], 0 }
   0x2   :  { %10 = vsyncpa [#allocation4], 0 }
   0x3   :  { %15 = vsyncadd [#allocation3], 96  ;;  %s1424_s12 = smov [#allocation2]   ;;  %s1352_s16 = scalar_lea.hbm %s1790_s0, 32 }
   0x4   :  { %s16_s13 = sshll.u32 %s1424_s12, 4  ;;  %p1353_p0 = scmp.ne.s32.totalorder %s1790_s0, %s1352_s16  ;;  %s17_s13 = int_to_ptr.vmem [resolvable:$true] %s16_s13 }
   0x5   :  { %p1356_p1 = scmp.lt.u32.totalorder %s1352_s16, %s1790_s0 }
   0x7   :  { %p1358_p2 = pnand %p1356_p1, %p1353_p0 }
   0x9   :  { %1361 = shalt.err (!%p1358_p2)
}
   0xa   :  { %s1362_s21 = scalar_lea.vmem %s17_s13, 32  ;;  %s1366_s22 = scalar_lea.vmem %s17_s13, 128 }
   0xb   :  { %p1363_p3 = scmp.ne.s32.totalorder %s17_s13, %s1362_s21  ;;  %p1367_p4 = scmp.lt.s32.totalorder %s17_s13, %s17_s13 }
   0xc   :  { %p1368_p5 = scmp.lt.s32.totalorder %s1366_s22, %s1362_s21 }
   0xe   :  { %p1369_p6 = por %p1368_p5, %p1367_p4 }
  0x10   :  { %p1370_p7 = pnand %p1369_p6, %p1363_p3 }
  0x12   :  { %1373 = shalt.err (!%p1370_p7)
}
  0x13   :  { %s1425_s23 = smov 32   ;;  %s1426_s24 = smov 2  }
  0x14   :  { %22 = dma.hbm_to_vmem [thread:$0]  %s1790_s0, 32, %s17_s13, [#allocation3], %s1425_s23, %s1425_s23, %s1426_s24  }
  0x15   :  { %s1427_s27 = smov [#allocation5]   ;;  %s1374_s4 = scalar_lea.hbm %s1792_s2, 2048 }
  0x16   :  { %s30_s28 = sshll.u32 %s1427_s27, 4  ;;  %p1375_p8 = scmp.ne.s32.totalorder %s1792_s2, %s1374_s4  ;;  %s31_s28 = int_to_ptr.vmem [resolvable:$true] %s30_s28 }
  0x17   :  { %p1378_p9 = scmp.lt.u32.totalorder %s1374_s4, %s1792_s2 }
  0x19   :  { %p1380_p10 = pnand %p1378_p9, %p1375_p8 }
  0x1b   :  { %1383 = shalt.err (!%p1380_p10)
}
  0x1c   :  { %s1384_s9 = scalar_lea.vmem %s31_s28, 2048  ;;  %p1389_p12 = scmp.lt.s32.totalorder %s31_s28, %s31_s28 }
  0x1d   :  { %p1385_p11 = scmp.ne.s32.totalorder %s31_s28, %s1384_s9  ;;  %p1390_p13 = scmp.lt.s32.totalorder %s1384_s9, %s1384_s9 }
  0x1f   :  { %p1391_p0 = por %p1390_p13, %p1389_p12 }
  0x21   :  { %p1392_p1 = pnand %p1391_p0, %p1385_p11 }
  0x23   :  { %1395 = shalt.err (!%p1392_p1)
}
  0x24   :  { %s1428_s0 = smov 128   ;;  %s1429_s10 = smov 8  }
  0x25   :  { %36 = dma.hbm_to_vmem [thread:$0]  %s1792_s2, 2048, %s31_s28, [#allocation6], %s1428_s0, %s1428_s0, %s1429_s10  }
  0x26   :  { %1418 = dma.done.wait [#allocation3], 128  }
  0x27   :  { %1419 = vsyncadd [#allocation3], 4294967168 }
  0x28   :  { %1420 = dma.done.wait [#allocation6], 2048  }
  0x29   :  { %1421 = vsyncadd [#allocation6], 4294965248  ;;  %v55_v0 = vld [vmem:[#allocation5] sm:$0xff]  ;;  %v56_v1 = vld [vmem:[#allocation5 + $0x8] sm:$0xff] }
  0x2a   :  { %v1477_v2 = vld [vmem:[#allocation5 + $0x10] sm:$0xff]  ;;  %v80_v3 = vand.u32 4294901760, %v55_v0  ;;  %v83_v4 = vand.u32 4294901760, %v56_v1  ;;  %v1479_v5 = vld [vmem:[#allocation5 + $0x18] sm:$0xff]  ;;  %v1482_v7 = vld [vmem:[#allocation5 + $0x20] sm:$0xff] }
  0x2b   :  { %v86_v6 = vand.u32 4294901760, %v1477_v2  ;;  %v1484_v8 = vld [vmem:[#allocation5 + $0x28] sm:$0xff]  ;;  %v89_v9 = vand.u32 4294901760, %v1479_v5  ;;  %v92_v11 = vand.u32 4294901760, %v1482_v7  ;;  %v1497_v14 = vld [vmem:[#allocation5 + $0x30] sm:$0xff]  ;;  %v1499_v15 = vld [vmem:[#allocation5 + $0x38] sm:$0xff] }
  0x2c   :  { %v1487_v10 = vpack.c.bf16 %v83_v4, %v80_v3  ;;  %v95_v12 = vand.u32 4294901760, %v1484_v8  ;;  %v43_v16 = vld [vmem:[#allocation2] sm:$0x3]  ;;  %v44_v17 = vld [vmem:[#allocation2 + $0x2] sm:$0x3]  ;;  %v98_v21 = vand.u32 4294901760, %v1497_v14  ;;  %v1557_v43 = vsub.f32 %v55_v0, %v80_v3 }
  0x2d   :  { %v1495_v13 = vpack.c.bf16 %v89_v9, %v86_v6  ;;  %v1505_v18 = vunpack.c.l.bf16 %v43_v16  ;;  %v45_v19 = vld [vmem:[#allocation2 + $0x4] sm:$0x3]  ;;  %v101_v22 = vand.u32 4294901760, %v1499_v15  ;;  %v1517_v23 = vld [vmem:[#allocation5 + $0x40] sm:$0xff]  ;;  %v1519_v24 = vunpack.c.l.bf16 %v44_v17  ;;  %v46_v25 = vld [vmem:[#allocation2 + $0x6] sm:$0x3] }
  0x2e   :  { %1136 = vmatprep.subr.bf16.mxu1 %v1487_v10  ;;  %1232 = vmatprep.subr.bf16.mxu0 %v1487_v10  ;;  %v1513_v20 = vpack.c.bf16 %v95_v12, %v92_v11  ;;  %v1521_v26 = vld [vmem:[#allocation5 + $0x48] sm:$0xff]  ;;  %v1525_v28 = vunpack.c.l.bf16 %v45_v19  ;;  %v1529_v30 = vunpack.c.l.bf16 %v46_v25  ;;  %v104_v31 = vand.u32 4294901760, %v1517_v23  ;;  %v1545_v35 = vld [vmem:[#allocation5 + $0x50] sm:$0xff]  ;;  %v1547_v36 = vld [vmem:[#allocation5 + $0x58] sm:$0xff] }
  0x2f   :  { %1138 = vmatpush3.bf16.msra.mxu1 %v1487_v10  ;;  %1234 = vmatpush3.bf16.msra.mxu0 %v1487_v10  ;;  %v51_v27 = vmul.f32 %v1505_v18, %v1505_v18  ;;  %v52_v29 = vmul.f32 %v1519_v24, %v1519_v24  ;;  %v1542_v33 = vpack.c.bf16 %v101_v22, %v98_v21  ;;  %v107_v34 = vand.u32 4294901760, %v1521_v26  ;;  %v1567_v45 = vld [vmem:[#allocation5 + $0x60] sm:$0xff]  ;;  %v1569_v46 = vld [vmem:[#allocation5 + $0x68] sm:$0xff]  ;;  %v1589_v54 = vld [vmem:[#allocation5 + $0x70] sm:$0xff] }
  0x30   :  { %1140 = vmatprep.subr.bf16.mxu1 %v1495_v13  ;;  %1236 = vmatprep.subr.bf16.mxu0 %v1495_v13  ;;  %v53_v32 = vmul.f32 %v1525_v28, %v1525_v28  ;;  %v54_v38 = vmul.f32 %v1529_v30, %v1529_v30  ;;  %v110_v41 = vand.u32 4294901760, %v1545_v35  ;;  %v113_v42 = vand.u32 4294901760, %v1547_v36  ;;  %v1591_v55 = vld [vmem:[#allocation5 + $0x78] sm:$0xff] }
  0x31   :  { %v75_v37 = vcombine.low %v51_v27, %v52_v29  ;;  %v1565_v44 = vpack.c.bf16 %v107_v34, %v104_v31  ;;  %v1574_v48 = vsub.f32 %v56_v1, %v83_v4  ;;  %v116_v52 = vand.u32 4294901760, %v1567_v45 }
  0x32   :  { %v76_v40 = vcombine.low %v53_v32, %v54_v38  ;;  %v1585_v51 = vpack.c.bf16 %v113_v42, %v110_v41  ;;  %v119_v53 = vand.u32 4294901760, %v1569_v46  ;;  %v183_v56 = vand.u32 4294901760, %v1557_v43 }
  0x33   :  { %1142 = vmatpush3.bf16.msra.mxu1 %v1495_v13  ;;  %1238 = vmatpush3.bf16.msra.mxu0 %v1495_v13  ;;  %v1551_v39 = vand.u32 4294901760, %v75_v37  ;;  %v190_v58 = vand.u32 4294901760, %v1574_v48  ;;  %v1601_v59 = vsub.f32 %v1477_v2, %v86_v6  ;;  %v1606_v60 = vsub.f32 %v1479_v5, %v89_v9 }
  0x34   :  { %1144 = vmatprep.subr.bf16.mxu1 %v1513_v20  ;;  %1240 = vmatprep.subr.bf16.mxu0 %v1513_v20  ;;  %v1577_v50 = vand.u32 4294901760, %v76_v40  ;;  %v122_v61 = vand.u32 4294901760, %v1589_v54  ;;  %v125_v62 = vand.u32 4294901760, %v1591_v55  ;;  %v1619_v1 = vpack.c.bf16 %v119_v53, %v116_v52 }
  0x35   :  { %v1572_v47 = vsub.f32 %v75_v37, %v1551_v39  ;;  %v184_v2 = vsub.f32 %v1557_v43, %v183_v56  ;;  %v1625_v3 = vsub.f32 %v1482_v7, %v92_v11  ;;  %v191_v4 = vsub.f32 %v1574_v48, %v190_v58 }
  0x36   :  { %v1611_v0 = vsub.f32 %v76_v40, %v1577_v50  ;;  %v197_v5 = vand.u32 4294901760, %v1601_v59  ;;  %v204_v6 = vand.u32 4294901760, %v1606_v60  ;;  %v1635_v9 = vsub.f32 %v1484_v8, %v95_v12 }
  0x37   :  { %1146 = vmatpush3.bf16.msra.mxu1 %v1513_v20  ;;  %1242 = vmatpush3.bf16.msra.mxu0 %v1513_v20  ;;  %v162_v49 = vand.u32 4294901760, %v1572_v47  ;;  %v1641_v7 = vpack.c.bf16 %v125_v62, %v122_v61  ;;  %v185_v16 = vand.u32 4294901760, %v184_v2  ;;  %v211_v17 = vand.u32 4294901760, %v1625_v3 }
  0x38   :  { %1148 = vmatprep.subr.bf16.mxu1 %v1542_v33  ;;  %1244 = vmatprep.subr.bf16.mxu0 %v1542_v33  ;;  %v172_v11 = vand.u32 4294901760, %v1611_v0  ;;  %v1650_v8 = vsub.f32 %v1497_v14, %v98_v21  ;;  %v1655_v12 = vsub.f32 %v1499_v15, %v101_v22  ;;  %v192_v19 = vand.u32 4294901760, %v191_v4 }
  0x39   :  { %v163_v57 = vsub.f32 %v1572_v47, %v162_v49  ;;  %1062 = vmatprep.mubr.f32.mxu0 %v162_v49  ;;  %v198_v25 = vsub.f32 %v1601_v59, %v197_v5  ;;  %v205_v27 = vsub.f32 %v1606_v60, %v204_v6  ;;  %v218_v29 = vand.u32 4294901760, %v1635_v9 }
  0x3a   :  { %v1263_v32 = vpack.c.bf16 %v190_v58, %v183_v56  ;;  %v173_v14 = vsub.f32 %v1611_v0, %v172_v11  ;;  %v1666_v21 = vsub.f32 %v1517_v23, %v104_v31  ;;  %v212_v15 = vsub.f32 %v1625_v3, %v211_v17 }
  0x3b   :  { %1150 = vmatpush3.bf16.msra.mxu1 %v1542_v33  ;;  %1246 = vmatpush3.bf16.msra.mxu0 %v1542_v33  ;;  %v164_v63 = vand.u32 4294901760, %v163_v57  ;;  %v225_v22 = vand.u32 4294901760, %v1650_v8  ;;  %v232_v37 = vand.u32 4294901760, %v1655_v12  ;;  %v1676_v38 = vsub.f32 %v1521_v26, %v107_v34 }
  0x3c   :  { %1152 = vmatprep.subr.bf16.mxu1 %v1565_v44  ;;  %1248 = vmatprep.subr.bf16.mxu0 %v1565_v44  ;;  %v1167_v23 = vpack.c.bf16 %v192_v19, %v185_v16  ;;  %v199_v31 = vand.u32 4294901760, %v198_v25  ;;  %v206_v40 = vand.u32 4294901760, %v205_v27  ;;  %v219_v49 = vsub.f32 %v1635_v9, %v218_v29 }
  0x3d   :  { %957 = vmatprep.mubr.f32.mxu1 %v164_v63  ;;  %v174_v56 = vand.u32 4294901760, %v173_v14  ;;  %v1267_v57 = vpack.c.bf16 %v204_v6, %v197_v5  ;;  %v239_v58 = vand.u32 4294901760, %v1666_v21  ;;  %v226_v26 = vsub.f32 %v1650_v8, %v225_v22 }
  0x3e   :  { %v233_v34 = vsub.f32 %v1655_v12, %v232_v37  ;;  %v246_v63 = vand.u32 4294901760, %v1676_v38  ;;  %v1690_v2 = vsub.f32 %v1545_v35, %v110_v41  ;;  %v1171_v4 = vpack.c.bf16 %v206_v40, %v199_v31 }
  0x3f   :  { %1154 = vmatpush3.bf16.msra.mxu1 %v1565_v44  ;;  %1250 = vmatpush3.bf16.msra.mxu0 %v1565_v44  ;;  %v213_v5 = vand.u32 4294901760, %v212_v15  ;;  %v220_v6 = vand.u32 4294901760, %v219_v49  ;;  %v1695_v16 = vsub.f32 %v1547_v36, %v113_v42  ;;  %v1271_v19 = vpack.c.bf16 %v218_v29, %v211_v17 }
  0x40   :  { %1156 = vmatprep.subr.bf16.mxu1 %v1585_v51  ;;  %1252 = vmatprep.subr.bf16.mxu0 %v1585_v51  ;;  %v240_v25 = vsub.f32 %v1666_v21, %v239_v58  ;;  %v227_v27 = vand.u32 4294901760, %v226_v26  ;;  %v234_v35 = vand.u32 4294901760, %v233_v34  ;;  %v247_v41 = vsub.f32 %v1676_v38, %v246_v63 }
  0x41   :  { %v253_v14 = vand.u32 4294901760, %v1690_v2  ;;  %v1175_v15 = vpack.c.bf16 %v220_v6, %v213_v5  ;;  %v260_v31 = vand.u32 4294901760, %v1695_v16  ;;  %v1704_v36 = vsub.f32 %v1567_v45, %v116_v52 }
  0x42   :  { %v1709_v42 = vsub.f32 %v1569_v46, %v119_v53  ;;  %v241_v17 = vand.u32 4294901760, %v240_v25  ;;  %v1179_v29 = vpack.c.bf16 %v234_v35, %v227_v27  ;;  %v1717_v45 = vsub.f32 %v1589_v54, %v122_v61 }
  0x43   :  { %1158 = vmatpush3.bf16.msra.mxu1 %v1585_v51  ;;  %1254 = vmatpush3.bf16.msra.mxu0 %v1585_v51  ;;  %v261_v46 = vsub.f32 %v1695_v16, %v260_v31  ;;  %v267_v52 = vand.u32 4294901760, %v1704_v36  ;;  %v1279_v40 = vpack.c.bf16 %v246_v63, %v239_v58 }
  0x44   :  { %1160 = vmatprep.subr.bf16.mxu1 %v1619_v1  ;;  %1256 = vmatprep.subr.bf16.mxu0 %v1619_v1  ;;  %v274_v53 = vand.u32 4294901760, %v1709_v42  ;;  %v281_v54 = vand.u32 4294901760, %v1717_v45 }
  0x45   :  { %v262_v61 = vand.u32 4294901760, %v261_v46 }
  0x46   :  { %v1287_v6 = vpack.c.bf16 %v274_v53, %v267_v52 }
  0x47   :  { %1162 = vmatpush3.bf16.msra.mxu1 %v1619_v1  ;;  %1258 = vmatpush3.bf16.msra.mxu0 %v1619_v1 }
  0x48   :  { %1164 = vmatprep.subr.bf16.mxu1 %v1641_v7  ;;  %1260 = vmatprep.subr.bf16.mxu0 %v1641_v7 }
  0x4b   :  { %1166 = vmatpush3.bf16.msra.mxu1 %v1641_v7  ;;  %1262 = vmatpush3.bf16.msra.mxu0 %v1641_v7 }
  0x4c   :  { %1168 = vmatprep.subr.bf16.mxu1 %v1167_v23  ;;  %1264 = vmatprep.subr.bf16.mxu0 %v1263_v32 }
  0x4e   :  { %958 = vmatmul.mubr.f32.vlgmr.msra.gmra.mrb[0].mxu1 %v174_v56  ;;  %1063 = vmatmul.mubr.f32.vlgmr.msra.gmra.mrb[0].mxu0 %v172_v11  ;;  %v1275_v11 = vpack.c.bf16 %v232_v37, %v225_v22  ;;  %v1725_v22 = vsub.f32 %v1591_v55, %v125_v62  ;;  %v268_v56 = vsub.f32 %v1704_v36, %v267_v52 }
  0x4f   :  { %1170 = vmatpush3.bf16.msra.mxu1 %v1167_v23  ;;  %1266 = vmatpush3.bf16.msra.mxu0 %v1263_v32  ;;  %v248_v32 = vand.u32 4294901760, %v247_v41  ;;  %v254_v23 = vsub.f32 %v1690_v2, %v253_v14  ;;  %v1283_v55 = vpack.c.bf16 %v260_v31, %v253_v14  ;;  %v282_v62 = vsub.f32 %v1717_v45, %v281_v54 }
  0x50   :  { %1172 = vmatprep.subr.bf16.mxu1 %v1171_v4  ;;  %1268 = vmatprep.subr.bf16.mxu0 %v1267_v57  ;;  %v288_v26 = vand.u32 4294901760, %v1725_v22  ;;  %v269_v34 = vand.u32 4294901760, %v268_v56  ;;  %v1199_v41 = vpack.c.bf16 %v1574_v48, %v1557_v43  ;;  %v1203_v14 = vpack.c.bf16 %v1606_v60, %v1601_v59 }
  0x51   :  { %992 = vmatprep.mubr.f32.mxu1 %v1551_v39  ;;  %1097 = vmatprep.mubr.f32.mxu0 %v1551_v39  ;;  %v1183_v37 = vpack.c.bf16 %v248_v32, %v241_v17  ;;  %v255_v49 = vand.u32 4294901760, %v254_v23  ;;  %v1207_v43 = vpack.c.bf16 %v1635_v9, %v1625_v3  ;;  %v1211_v48 = vpack.c.bf16 %v1655_v12, %v1650_v8 }
  0x52   :  { %v1291_v35 = vpack.c.bf16 %v288_v26, %v281_v54 }
  0x53   :  { %1174 = vmatpush3.bf16.msra.mxu1 %v1171_v4  ;;  %1270 = vmatpush3.bf16.msra.mxu0 %v1267_v57  ;;  %v275_v57 = vsub.f32 %v1709_v42, %v274_v53  ;;  %v1187_v58 = vpack.c.bf16 %v262_v61, %v255_v49  ;;  %v289_v4 = vsub.f32 %v1725_v22, %v288_v26 }
  0x54   :  { %1176 = vmatprep.subr.bf16.mxu1 %v1175_v15  ;;  %1272 = vmatprep.subr.bf16.mxu0 %v1271_v19 }
  0x55   :  { %v276_v63 = vand.u32 4294901760, %v275_v57  ;;  %v290_v25 = vand.u32 4294901760, %v289_v4 }
  0x57   :  { %1178 = vmatpush3.bf16.msra.mxu1 %v1175_v15  ;;  %1274 = vmatpush3.bf16.msra.mxu0 %v1271_v19  ;;  %v1191_v5 = vpack.c.bf16 %v276_v63, %v269_v34  ;;  %v283_v19 = vand.u32 4294901760, %v282_v62 }
  0x58   :  { %1180 = vmatprep.subr.bf16.mxu1 %v1179_v29  ;;  %1276 = vmatprep.subr.bf16.mxu0 %v1275_v11 }
  0x59   :  { %v1195_v27 = vpack.c.bf16 %v290_v25, %v283_v19 }
  0x5b   :  { %1182 = vmatpush3.bf16.msra.mxu1 %v1179_v29  ;;  %1278 = vmatpush3.bf16.msra.mxu0 %v1275_v11 }
  0x5c   :  { %1184 = vmatprep.subr.bf16.mxu1 %v1183_v37  ;;  %1280 = vmatprep.subr.bf16.mxu0 %v1279_v40 }
  0x5f   :  { %1186 = vmatpush3.bf16.msra.mxu1 %v1183_v37  ;;  %1282 = vmatpush3.bf16.msra.mxu0 %v1279_v40 }
  0x60   :  { %1188 = vmatprep.subr.bf16.mxu1 %v1187_v58  ;;  %1284 = vmatprep.subr.bf16.mxu0 %v1283_v55 }
  0x63   :  { %1190 = vmatpush3.bf16.msra.mxu1 %v1187_v58  ;;  %1286 = vmatpush3.bf16.msra.mxu0 %v1283_v55 }
  0x64   :  { %1192 = vmatprep.subr.bf16.mxu1 %v1191_v5  ;;  %1288 = vmatprep.subr.bf16.mxu0 %v1287_v6 }
  0x67   :  { %1194 = vmatpush3.bf16.msra.mxu1 %v1191_v5  ;;  %1290 = vmatpush3.bf16.msra.mxu0 %v1287_v6 }
  0x68   :  { %1196 = vmatprep.subr.bf16.mxu1 %v1195_v27  ;;  %1292 = vmatprep.subr.bf16.mxu0 %v1291_v35 }
  0x6b   :  { %1198 = vmatpush3.bf16.msra.mxu1 %v1195_v27  ;;  %1294 = vmatpush3.bf16.msra.mxu0 %v1291_v35 }
  0x6c   :  { %1200 = vmatprep.subr.bf16.mxu1 %v1199_v41  ;;  %1296 = vmatprep.subr.bf16.mxu0 %v1487_v10 }
  0x6e   :  { %993 = vmatmul.mubr.f32.vlgmr.msra.gmra.mrb[0].mxu1 %v1577_v50  ;;  %1098 = vmatmul.mubr.f32.vlgmr.msra.gmra.mrb[0].mxu0 %v1577_v50 }
  0x6f   :  { %1202 = vmatpush3.bf16.msra.mxu1 %v1199_v41  ;;  %1298 = vmatpush3.bf16.msra.mxu0 %v1487_v10  ;;  %v1215_v10 = vpack.c.bf16 %v1676_v38, %v1666_v21 }
  0x70   :  { %1204 = vmatprep.subr.bf16.mxu1 %v1203_v14  ;;  %1300 = vmatprep.subr.bf16.mxu0 %v1495_v13 }
  0x71   :  { %1027 = vmatprep.mubr.f32.mxu1 %v1572_v47  ;;  %1132 = vmatprep.mubr.f32.mxu0 %v1551_v39 }
  0x73   :  { %1206 = vmatpush3.bf16.msra.mxu1 %v1203_v14  ;;  %1302 = vmatpush3.bf16.msra.mxu0 %v1495_v13  ;;  %v1219_v13 = vpack.c.bf16 %v1695_v16, %v1690_v2 }
  0x74   :  { %1208 = vmatprep.subr.bf16.mxu1 %v1207_v43  ;;  %1304 = vmatprep.subr.bf16.mxu0 %v1513_v20 }
  0x77   :  { %1210 = vmatpush3.bf16.msra.mxu1 %v1207_v43  ;;  %1306 = vmatpush3.bf16.msra.mxu0 %v1513_v20  ;;  %v1223_v20 = vpack.c.bf16 %v1709_v42, %v1704_v36 }
  0x78   :  { %1212 = vmatprep.subr.bf16.mxu1 %v1211_v48  ;;  %1308 = vmatprep.subr.bf16.mxu0 %v1542_v33 }
  0x7b   :  { %1214 = vmatpush3.bf16.msra.mxu1 %v1211_v48  ;;  %1310 = vmatpush3.bf16.msra.mxu0 %v1542_v33  ;;  %v1227_v33 = vpack.c.bf16 %v1725_v22, %v1717_v45 }
  0x7c   :  { %1216 = vmatprep.subr.bf16.mxu1 %v1215_v10  ;;  %1312 = vmatprep.subr.bf16.mxu0 %v1565_v44 }
  0x7f   :  { %1218 = vmatpush3.bf16.msra.mxu1 %v1215_v10  ;;  %1314 = vmatpush3.bf16.msra.mxu0 %v1565_v44 }
  0x80   :  { %1220 = vmatprep.subr.bf16.mxu1 %v1219_v13  ;;  %1316 = vmatprep.subr.bf16.mxu0 %v1585_v51 }
  0x83   :  { %1222 = vmatpush3.bf16.msra.mxu1 %v1219_v13  ;;  %1318 = vmatpush3.bf16.msra.mxu0 %v1585_v51 }
  0x84   :  { %1224 = vmatprep.subr.bf16.mxu1 %v1223_v20  ;;  %1320 = vmatprep.subr.bf16.mxu0 %v1619_v1 }
  0x87   :  { %1226 = vmatpush3.bf16.msra.mxu1 %v1223_v20  ;;  %1322 = vmatpush3.bf16.msra.mxu0 %v1619_v1  ;;  %v816_v1 = vld [vmem:[%s1791_s1] ss:$0 sm:$0xff] }
  0x88   :  { %1228 = vmatprep.subr.bf16.mxu1 %v1227_v33  ;;  %1324 = vmatprep.subr.bf16.mxu0 %v1641_v7 }
  0x8b   :  { %1230 = vmatpush3.bf16.msra.mxu1 %v1227_v33  ;;  %1326 = vmatpush3.bf16.msra.mxu0 %v1641_v7 }
  0x8e   :  { %1028 = vmatmul.mubr.f32.vlgmr.msra.gmra.mrb[0].mxu1 %v1611_v0  ;;  %1133 = vmatmul.mubr.f32.vlgmr.msra.gmra.mrb[0].mxu0 %v1577_v50  ;;  %v782_v50 = vcombine.high %v816_v1, %v816_v1 }
 0x161   :  { %v1029_v39 = vpop.f32.mrb[0].mxu1  ;;  %v1134_v44 = vpop.f32.mrb[0].mxu0 }
 0x162   :  { %v1327_v47 = vadd.f32 1e-06, %v1029_v39  ;;  %v437_v51 = vpop.f32.mrb[1].mxu1  ;;  %v753_v59 = vpop.f32.mrb[1].mxu0 }
 0x163   :  { %v1329_v60 = vadd.f32 1e-06, %v437_v51 }
 0x164   :  { %v1328_v3 = vadd.f32 %v1327_v47, %v1134_v44 }
 0x165   :  { %v1330_v9 = vadd.f32 %v1329_v60, %v753_v59 }
 0x166   :  { %1348 = vrsqrt.f32 %v1328_v3 }
 0x167   :  { %1350 = vrsqrt.f32 %v1330_v9 }
 0x170   :  { %v1349_v8 = vpop.eup %1348 }
 0x171   :  { %v1351_v7 = vpop.eup %1350  ;;  %v768_v12 = vcombine.high %v1349_v8, %v1349_v8  ;;  %v773_v0 = vmul.f32 %v1349_v8, %v1525_v28 }
 0x172   :  { %v767_v21 = vcombine.high %v1351_v7, %v1351_v7  ;;  %v771_v38 = vmul.f32 %v1351_v7, %v1505_v18 }
 0x173   :  { %v774_v2 = vmul.f32 %v768_v12, %v1529_v30  ;;  %v786_v15 = vmul.f32 %v816_v1, %v773_v0 }
 0x174   :  { %v772_v16 = vmul.f32 %v767_v21, %v1519_v24  ;;  %v784_v36 = vmul.f32 %v816_v1, %v771_v38 }
 0x175   :  { %v787_v31 = vmul.f32 %v782_v50, %v774_v2 }
 0x176   :  { %v785_v42 = vmul.f32 %v782_v50, %v772_v16 }
 0x177   :  { %v793_v11 = vcombine.low %v786_v15, %v787_v31 }
 0x178   :  { %v792_v17 = vcombine.low %v784_v36, %v785_v42 }
 0x179   :  { %797 = vst [vmem:[#allocation7 + $0x8] sm:$0xff] %v793_v11 }
 0x17a   :  { %796 = vst [vmem:[#allocation7] sm:$0xff] %v792_v17 }
 0x17b   :  { %802 = vsyncadd [#allocation4], 192  ;;  %s1430_s1 = smov [#allocation7]  }
 0x17c   :  { %s803_s14 = sshll.u32 %s1430_s1, 4  ;;  %s804_s14 = int_to_ptr.vmem [resolvable:$true] %s803_s14 }
 0x17d   :  { %s1396_s15 = scalar_lea.vmem %s804_s14, 64  ;;  %s1400_s16 = scalar_lea.vmem %s804_s14, 256 }
 0x17e   :  { %p1397_p2 = scmp.ne.s32.totalorder %s804_s14, %s1396_s15  ;;  %p1401_p3 = scmp.lt.s32.totalorder %s804_s14, %s804_s14 }
 0x17f   :  { %p1402_p4 = scmp.lt.s32.totalorder %s1400_s16, %s1396_s15 }
 0x181   :  { %p1403_p5 = por %p1402_p4, %p1401_p3 }
 0x183   :  { %p1404_p6 = pnand %p1403_p5, %p1397_p2 }
 0x185   :  { %1407 = shalt.err (!%p1404_p6)
}
 0x186   :  { %s1408_s19 = scalar_lea.hbm %s1793_s3, 64 }
 0x187   :  { %p1409_p7 = scmp.ne.s32.totalorder %s1793_s3, %s1408_s19  ;;  %p1412_p8 = scmp.lt.u32.totalorder %s1408_s19, %s1793_s3 }
 0x189   :  { %p1414_p9 = pnand %p1412_p8, %p1409_p7 }
 0x18b   :  { %1417 = shalt.err (!%p1414_p9)
}
 0x18c   :  { %s1431_s24 = smov 64   ;;  %s1432_s25 = smov 4  }
 0x18d   :  { %809 = dma.vmem_to_hbm [thread:$0]  %s804_s14, 64, %s1793_s3, [#allocation4], %s1431_s24, %s1431_s24, %s1432_s25  }
 0x18e   :  { %1422 = dma.done.wait [#allocation4], 256  }
 0x18f   :  { %1423 = vsyncadd [#allocation4], 4294967040 }
 0x190   :  { %813 = vsyncpa [#allocation3], 1 }
 0x191   :  { %814 = vsyncpa [#allocation6], 1 }
 0x192   :  { %815 = vsyncpa [#allocation4], 1 }

</bundles_post_ra>
